<compile_context>
chip_gen: v7x
topology: tpu7x:2x2x1
jax: 0.10.0
libtpu: 0.0.40
codegen_flags: <defaults>
</compile_context>

<pallas_src>
import functools
import math

import jax
import jax.numpy as jnp
from jax.experimental import pallas as pl
from jax.experimental.pallas import tpu as pltpu


def _sigmoid(x):
    # tanh-form sigmoid: a single EUP op per element instead of exp + reciprocal.
    return 0.5 * jnp.tanh(0.5 * x) + 0.5


def childsum_kernel(hl_ref, hr_ref, cl_ref, cr_ref,
                    wr_ref, br_ref, wf_ref, bf_ref,
                    h_out_ref, c_out_ref, *, gate_dtype):
    mm_dtype = wr_ref.dtype            # matmul input dtype (f32 or bf16)

    hl = hl_ref[...]
    hr = hr_ref[...]
    B, H = hl.shape                    # B == batch tile (block shape)

    # --- reduce_layer on the child sum -> i, g, o ---------------------------
    child_sum = (hl.astype(jnp.float32) + hr.astype(jnp.float32)).astype(mm_dtype)
    proj = jnp.dot(child_sum, wr_ref[...],
                   preferred_element_type=jnp.float32)
    proj = proj + br_ref[...].astype(jnp.float32)

    # --- reduce_layer_f on both children, fused into ONE matmul -------------
    # (equivalent to torch.cat([h_l, h_r], dim=0) -> linear -> chunk(dim=0))
    # Cast BEFORE the concat so the row-stack copy is done in the narrow dtype.
    children = jnp.concatenate([hl.astype(mm_dtype), hr.astype(mm_dtype)], axis=0)
    proj_f = jnp.dot(children, wf_ref[...],
                     preferred_element_type=jnp.float32)
    proj_f = proj_f + bf_ref[...].astype(jnp.float32)

    # --- gates (EUP); optionally bf16 on v6e/v7x. Cell accumulation is f32. --
    pg = proj.astype(gate_dtype)
    pfg = proj_f.astype(gate_dtype)
    i = _sigmoid(pg[:, 0 * H:1 * H]).astype(jnp.float32)
    g = jnp.tanh(pg[:, 1 * H:2 * H]).astype(jnp.float32)
    o = _sigmoid(pg[:, 2 * H:3 * H]).astype(jnp.float32)
    f_l = _sigmoid(pfg[:B, :]).astype(jnp.float32)
    f_r = _sigmoid(pfg[B:, :]).astype(jnp.float32)

    cl = cl_ref[...].astype(jnp.float32)
    cr = cr_ref[...].astype(jnp.float32)

    c = i * g + f_l * cl + f_r * cr
    h = o * jnp.tanh(c)

    h_out_ref[...] = h.astype(h_out_ref.dtype)
    c_out_ref[...] = c.astype(c_out_ref.dtype)


def child_sum_cell(hx_l, hx_r, params, *,
                   tile_b=None,
                   matmul_dtype=None,
                   gate_dtype=None,
                   num_tensorcores=1,
                   vmem_budget_bytes=32 * 1024 * 1024,
                   single_buffer_weights=True):
    """hx_l = (h_l, c_l), hx_r = (h_r, c_r); each (B, H). Returns (h, c).

    tile_b:           batch tile per grid step; default picks the largest tile
                      that fits `vmem_budget_bytes` (grid=1 when the whole batch
                      fits on a single-TC chip).
    matmul_dtype:     optional cast of MXU inputs (e.g. jnp.bfloat16); accumulation
                      stays float32. Pre-cast params once outside any tree loop.
                      Leave None on v5e (its 128-wide MXU gains nothing from bf16).
    gate_dtype:       dtype for the sigmoid/tanh nonlinearities (bf16 pays on
                      v6e/v7x EUP); cell-state accumulation is always float32.
    num_tensorcores:  pass 2 on v7x so the "parallel" batch axis is split across
                      both TensorCores instead of collapsing to grid=1.
    """
    h_l, c_l = hx_l
    h_r, c_r = hx_r
    wr, br, wf, bf = params  # wr: (H, 3H), br: (1, 3H), wf: (H, H), bf: (1, H)

    B, H = h_l.shape

    if matmul_dtype is not None and wr.dtype != matmul_dtype:
        wr = wr.astype(matmul_dtype)
        wf = wf.astype(matmul_dtype)
    if gate_dtype is None:
        gate_dtype = jnp.float32

    mm_bytes = jnp.dtype(wr.dtype).itemsize
    bias_bytes = jnp.dtype(br.dtype).itemsize
    h_bytes = jnp.dtype(h_l.dtype).itemsize
    c_bytes = jnp.dtype(c_l.dtype).itemsize

    # ---- batch tile selection from a VMEM budget ---------------------------
    weight_vmem = (wr.size + wf.size) * mm_bytes + (br.size + bf.size) * bias_bytes
    if not single_buffer_weights:
        weight_vmem *= 2
    # Per batch-row VMEM: 6 double-buffered state/output streams plus ~16 rows
    # of f32 intermediates (child_sum, children, proj, proj_f, gates, c, h).
    per_row = 2 * (3 * h_bytes + 3 * c_bytes) * H + 16 * H * 4

    if tile_b is None:
        avail = max(vmem_budget_bytes - weight_vmem, 8 * per_row)
        tile_b = int(avail // per_row)
        # Keep the grid a multiple of num_tensorcores (v7x: 2) so "parallel"
        # actually feeds every core; on 1-TC chips this aims straight for grid=1.
        tile_b = min(tile_b, pl.cdiv(B, num_tensorcores))
        tile_b = max(8, (tile_b // 8) * 8)
    tile_b = min(int(tile_b), B)
    # (8,128) block constraint: fall back to one full-batch tile if needed.
    # Prefer tile_b dividing B; a ragged last tile is correct but wastes work.
    if tile_b != B and (tile_b % 8 != 0 or H % 128 != 0):
        tile_b = B
    grid = (pl.cdiv(B, tile_b),)

    state_spec = pl.BlockSpec((tile_b, H), lambda i: (i, 0))
    # Constant index maps -> weights/biases loaded once and kept VMEM-resident.
    # Single-buffered: the second pipeline buffer would never be used.
    w_mode = pl.Buffered(1) if single_buffer_weights else None
    wr_spec = pl.BlockSpec((H, 3 * H), lambda i: (0, 0), pipeline_mode=w_mode)
    br_spec = pl.BlockSpec((1, 3 * H), lambda i: (0, 0), pipeline_mode=w_mode)
    wf_spec = pl.BlockSpec((H, H), lambda i: (0, 0), pipeline_mode=w_mode)
    bf_spec = pl.BlockSpec((1, H), lambda i: (0, 0), pipeline_mode=w_mode)
    # NOTE: single-buffered f32 weights total 16*H^2 bytes; on v7x (64 MiB
    # physical VMEM) they should be tiled along the 3H axis (extra grid dim)
    # from roughly H >= ~1400 f32 (~2000 bf16). Unnecessary at these sizes.

    # Explicit scoped-VMEM limit sized from the actual buffers (+25% headroom),
    # clamped to the v7x physical ceiling. Raise the clamp on v5e/v6e if a
    # very large H config needs it.
    est_vmem = (weight_vmem
                + 2 * tile_b * H * (3 * h_bytes + 3 * c_bytes)
                + 16 * tile_b * H * 4)
    vmem_limit = int(min(max(est_vmem * 5 // 4, 16 * 1024 * 1024),
                         64 * 1024 * 1024))

    flops = 2 * 5 * B * H * H                 # 3BH^2 (reduce) + 2BH^2 (forget)
    transcendentals = 6 * B * H               # 5 gates + tanh(c) per element
    bytes_accessed = (B * H * (3 * h_bytes + 3 * c_bytes)
                      + wr.size * mm_bytes + wf.size * mm_bytes
                      + br.size * bias_bytes + bf.size * bias_bytes)

    kernel = functools.partial(childsum_kernel, gate_dtype=gate_dtype)

    h_out, c_out = pl.pallas_call(
        kernel,
        out_shape=(
            jax.ShapeDtypeStruct((B, H), h_l.dtype),   # h follows h dtype (may be bf16)
            jax.ShapeDtypeStruct((B, H), c_l.dtype),   # c follows c dtype (keep f32)
        ),
        grid=grid,
        in_specs=[state_spec, state_spec, state_spec, state_spec,
                  wr_spec, br_spec, wf_spec, bf_spec],
        out_specs=(state_spec, state_spec),
        compiler_params=pltpu.CompilerParams(
            dimension_semantics=("parallel",),
            vmem_limit_bytes=vmem_limit),
        cost_estimate=pl.CostEstimate(flops=flops,
                                      transcendentals=transcendentals,
                                      bytes_accessed=bytes_accessed),
    )(h_l, h_r, c_l, c_r, wr, br, wf, bf)
    return h_out, c_out


def init_params(key, hidden_size, dtype=jnp.float32):
    """PyTorch-default init: uniform(-1/sqrt(H), 1/sqrt(H)) for all params."""
    stdv = 1.0 / math.sqrt(hidden_size)
    k1, k2, k3, k4 = jax.random.split(key, 4)
    # nn.Linear(hidden, 3*hidden): weight (3H, H) -> stored transposed (H, 3H)
    wr = jax.random.uniform(k1, (hidden_size, 3 * hidden_size),
                            minval=-stdv, maxval=stdv, dtype=dtype)
    br = jax.random.uniform(k2, (1, 3 * hidden_size),
                            minval=-stdv, maxval=stdv, dtype=dtype)
    # nn.Linear(hidden, hidden): weight (H, H) -> stored transposed (H, H)
    wf = jax.random.uniform(k3, (hidden_size, hidden_size),
                            minval=-stdv, maxval=stdv, dtype=dtype)
    bf = jax.random.uniform(k4, (1, hidden_size),
                            minval=-stdv, maxval=stdv, dtype=dtype)
    return wr, br, wf, bf


def reference(hx_l, hx_r, params):
    """Plain-JAX reference mirroring the PyTorch forward (f32)."""
    h_l, c_l = hx_l
    h_r, c_r = hx_r
    wr, br, wf, bf = params
    H = h_l.shape[-1]
    child_sum = h_l + h_r
    proj = child_sum @ wr + br
    fl = jax.nn.sigmoid(h_l @ wf + bf)
    fr = jax.nn.sigmoid(h_r @ wf + bf)
    i = jax.nn.sigmoid(proj[:, :H])
    g = jnp.tanh(proj[:, H:2 * H])
    o = jax.nn.sigmoid(proj[:, 2 * H:])
    c = i * g + fl * c_l + fr * c_r
    h = o * jnp.tanh(c)
    return h, c


if __name__ == "__main__":
    # Small, lane-aligned demo shape: a handful of tree nodes batched together.
    B, H = 16, 128

    key = jax.random.PRNGKey(0)
    kp, kh1, kc1, kh2, kc2 = jax.random.split(key, 5)

    params = init_params(kp, H)
    h_l = jax.random.normal(kh1, (B, H), dtype=jnp.float32)
    c_l = jax.random.normal(kc1, (B, H), dtype=jnp.float32)
    h_r = jax.random.normal(kh2, (B, H), dtype=jnp.float32)
    c_r = jax.random.normal(kc2, (B, H), dtype=jnp.float32)

    h_ref, c_ref = reference((h_l, c_l), (h_r, c_r), params)

    # Default path: f32 matmul inputs, f32 gates (tight tolerance).
    h_out, c_out = child_sum_cell((h_l, c_l), (h_r, c_r), params)
    jax.block_until_ready((h_out, c_out))
    assert jnp.allclose(h_out, h_ref, atol=2e-4, rtol=2e-4)
    assert jnp.allclose(c_out, c_ref, atol=2e-4, rtol=2e-4)

    # v6e/v7x-style path: bf16 MXU inputs + bf16 gate nonlinearities,
    # f32 accumulation throughout (looser tolerance).
    h_bf, c_bf = child_sum_cell((h_l, c_l), (h_r, c_r), params,
                                matmul_dtype=jnp.bfloat16,
                                gate_dtype=jnp.bfloat16)
    jax.block_until_ready((h_bf, c_bf))
    assert jnp.allclose(h_bf, h_ref, atol=1e-1, rtol=1e-1)
    assert jnp.allclose(c_bf, c_ref, atol=1e-1, rtol=1e-1)

    print("KERNEL_OK")
</pallas_src>

<mosaic_0001>
module attributes {stable_mosaic.version = 11 : i64} {
  func.func @childsum_kernel(%arg0: i32, %arg1: memref<16x128xf32, #tpu.memory_space<vmem>>, %arg2: memref<16x128xf32, #tpu.memory_space<vmem>>, %arg3: memref<16x128xf32, #tpu.memory_space<vmem>>, %arg4: memref<16x128xf32, #tpu.memory_space<vmem>>, %arg5: memref<128x384xf32, #tpu.memory_space<vmem>>, %arg6: memref<1x384xf32, #tpu.memory_space<vmem>>, %arg7: memref<128x128xf32, #tpu.memory_space<vmem>>, %arg8: memref<1x128xf32, #tpu.memory_space<vmem>>, %arg9: memref<16x128xf32, #tpu.memory_space<vmem>>, %arg10: memref<16x128xf32, #tpu.memory_space<vmem>>) attributes {dimension_semantics = [#tpu.dimension_semantics<parallel>], iteration_bounds = array<i64: 1>, scalar_prefetch = 0 : i64, scratch_operands = 0 : i64, tpu.core_type = #tpu.core_type<tc>, window_params = [{transform_indices = @transform_0, window_bounds = array<i64: 16, 128>}, {transform_indices = @transform_1, window_bounds = array<i64: 16, 128>}, {transform_indices = @transform_2, window_bounds = array<i64: 16, 128>}, {transform_indices = @transform_3, window_bounds = array<i64: 16, 128>}, {pipeline_mode = #tpu.pipeline_mode<synchronous>, transform_indices = @transform_4, window_bounds = array<i64: 128, 384>}, {pipeline_mode = #tpu.pipeline_mode<synchronous>, transform_indices = @transform_5, window_bounds = array<i64: 1, 384>}, {pipeline_mode = #tpu.pipeline_mode<synchronous>, transform_indices = @transform_6, window_bounds = array<i64: 128, 128>}, {pipeline_mode = #tpu.pipeline_mode<synchronous>, transform_indices = @transform_7, window_bounds = array<i64: 1, 128>}, {transform_indices = @transform_8, window_bounds = array<i64: 16, 128>}, {transform_indices = @transform_9, window_bounds = array<i64: 16, 128>}]} {
    %c0 = arith.constant 0 : index
    %c0_0 = arith.constant 0 : index
    %0 = vector.load %arg1[%c0, %c0_0] : memref<16x128xf32, #tpu.memory_space<vmem>>, vector<16x128xf32>
    %c0_1 = arith.constant 0 : index
    %c0_2 = arith.constant 0 : index
    %1 = vector.load %arg2[%c0_1, %c0_2] : memref<16x128xf32, #tpu.memory_space<vmem>>, vector<16x128xf32>
    %2 = arith.addf %0, %1 : vector<16x128xf32>
    %c0_3 = arith.constant 0 : index
    %c0_4 = arith.constant 0 : index
    %3 = vector.load %arg5[%c0_3, %c0_4] : memref<128x384xf32, #tpu.memory_space<vmem>>, vector<128x384xf32>
    %cst = arith.constant dense<0.000000e+00> : vector<16x384xf32>
    %4 = tpu.matmul %2, %3, %cst {dimension_numbers = #tpu.dot_dimension_numbers<[1], [0], [0], [1], [0, 0, 1, 1], [], []>} : vector<16x128xf32>, vector<128x384xf32>, vector<16x384xf32> -> vector<16x384xf32>
    %c0_5 = arith.constant 0 : index
    %c0_6 = arith.constant 0 : index
    %5 = vector.load %arg6[%c0_5, %c0_6] : memref<1x384xf32, #tpu.memory_space<vmem>>, vector<1x384xf32>
    %6 = vector.broadcast %5 : vector<1x384xf32> to vector<16x384xf32>
    %7 = arith.addf %4, %6 : vector<16x384xf32>
    %8 = tpu.concatenate %0, %1 in 0 : vector<16x128xf32>, vector<16x128xf32> -> vector<32x128xf32>
    %c0_7 = arith.constant 0 : index
    %c0_8 = arith.constant 0 : index
    %9 = vector.load %arg7[%c0_7, %c0_8] : memref<128x128xf32, #tpu.memory_space<vmem>>, vector<128x128xf32>
    %cst_9 = arith.constant dense<0.000000e+00> : vector<32x128xf32>
    %10 = tpu.matmul %8, %9, %cst_9 {dimension_numbers = #tpu.dot_dimension_numbers<[1], [0], [0], [1], [0, 0, 1, 1], [], []>} : vector<32x128xf32>, vector<128x128xf32>, vector<32x128xf32> -> vector<32x128xf32>
    %c0_10 = arith.constant 0 : index
    %c0_11 = arith.constant 0 : index
    %11 = vector.load %arg8[%c0_10, %c0_11] : memref<1x128xf32, #tpu.memory_space<vmem>>, vector<1x128xf32>
    %12 = vector.broadcast %11 : vector<1x128xf32> to vector<32x128xf32>
    %13 = arith.addf %10, %12 : vector<32x128xf32>
    %14 = vector.extract_strided_slice %7 {offsets = [0, 0], sizes = [16, 128], strides = [1, 1]} : vector<16x384xf32> to vector<16x128xf32>
    %cst_12 = arith.constant 5.000000e-01 : f32
    %15 = vector.broadcast %cst_12 : f32 to vector<16x128xf32>
    %16 = arith.mulf %15, %14 : vector<16x128xf32>
    %17 = math.tanh %16 : vector<16x128xf32>
    %cst_13 = arith.constant 5.000000e-01 : f32
    %18 = vector.broadcast %cst_13 : f32 to vector<16x128xf32>
    %19 = arith.mulf %18, %17 : vector<16x128xf32>
    %cst_14 = arith.constant 5.000000e-01 : f32
    %20 = vector.broadcast %cst_14 : f32 to vector<16x128xf32>
    %21 = arith.addf %19, %20 : vector<16x128xf32>
    %22 = vector.extract_strided_slice %7 {offsets = [0, 128], sizes = [16, 128], strides = [1, 1]} : vector<16x384xf32> to vector<16x128xf32>
    %23 = math.tanh %22 : vector<16x128xf32>
    %24 = vector.extract_strided_slice %7 {offsets = [0, 256], sizes = [16, 128], strides = [1, 1]} : vector<16x384xf32> to vector<16x128xf32>
    %cst_15 = arith.constant 5.000000e-01 : f32
    %25 = vector.broadcast %cst_15 : f32 to vector<16x128xf32>
    %26 = arith.mulf %25, %24 : vector<16x128xf32>
    %27 = math.tanh %26 : vector<16x128xf32>
    %cst_16 = arith.constant 5.000000e-01 : f32
    %28 = vector.broadcast %cst_16 : f32 to vector<16x128xf32>
    %29 = arith.mulf %28, %27 : vector<16x128xf32>
    %cst_17 = arith.constant 5.000000e-01 : f32
    %30 = vector.broadcast %cst_17 : f32 to vector<16x128xf32>
    %31 = arith.addf %29, %30 : vector<16x128xf32>
    %32 = vector.extract_strided_slice %13 {offsets = [0, 0], sizes = [16, 128], strides = [1, 1]} : vector<32x128xf32> to vector<16x128xf32>
    %cst_18 = arith.constant 5.000000e-01 : f32
    %33 = vector.broadcast %cst_18 : f32 to vector<16x128xf32>
    %34 = arith.mulf %33, %32 : vector<16x128xf32>
    %35 = math.tanh %34 : vector<16x128xf32>
    %cst_19 = arith.constant 5.000000e-01 : f32
    %36 = vector.broadcast %cst_19 : f32 to vector<16x128xf32>
    %37 = arith.mulf %36, %35 : vector<16x128xf32>
    %cst_20 = arith.constant 5.000000e-01 : f32
    %38 = vector.broadcast %cst_20 : f32 to vector<16x128xf32>
    %39 = arith.addf %37, %38 : vector<16x128xf32>
    %40 = vector.extract_strided_slice %13 {offsets = [16, 0], sizes = [16, 128], strides = [1, 1]} : vector<32x128xf32> to vector<16x128xf32>
    %cst_21 = arith.constant 5.000000e-01 : f32
    %41 = vector.broadcast %cst_21 : f32 to vector<16x128xf32>
    %42 = arith.mulf %41, %40 : vector<16x128xf32>
    %43 = math.tanh %42 : vector<16x128xf32>
    %cst_22 = arith.constant 5.000000e-01 : f32
    %44 = vector.broadcast %cst_22 : f32 to vector<16x128xf32>
    %45 = arith.mulf %44, %43 : vector<16x128xf32>
    %cst_23 = arith.constant 5.000000e-01 : f32
    %46 = vector.broadcast %cst_23 : f32 to vector<16x128xf32>
    %47 = arith.addf %45, %46 : vector<16x128xf32>
    %c0_24 = arith.constant 0 : index
    %c0_25 = arith.constant 0 : index
    %48 = vector.load %arg3[%c0_24, %c0_25] : memref<16x128xf32, #tpu.memory_space<vmem>>, vector<16x128xf32>
    %c0_26 = arith.constant 0 : index
    %c0_27 = arith.constant 0 : index
    %49 = vector.load %arg4[%c0_26, %c0_27] : memref<16x128xf32, #tpu.memory_space<vmem>>, vector<16x128xf32>
    %50 = arith.mulf %21, %23 : vector<16x128xf32>
    %51 = arith.mulf %39, %48 : vector<16x128xf32>
    %52 = arith.addf %50, %51 : vector<16x128xf32>
    %53 = arith.mulf %47, %49 : vector<16x128xf32>
    %54 = arith.addf %52, %53 : vector<16x128xf32>
    %55 = math.tanh %54 : vector<16x128xf32>
    %56 = arith.mulf %31, %55 : vector<16x128xf32>
    %c0_28 = arith.constant 0 : index
    %c0_29 = arith.constant 0 : index
    %57 = vector.load %arg9[%c0_28, %c0_29] : memref<16x128xf32, #tpu.memory_space<vmem>>, vector<16x128xf32>
    tpu.vector_store %arg9[%c0_28, %c0_29], %56 {strides = array<i32>} : memref<16x128xf32, #tpu.memory_space<vmem>>, vector<16x128xf32>,
    %c0_30 = arith.constant 0 : index
    %c0_31 = arith.constant 0 : index
    %58 = vector.load %arg10[%c0_30, %c0_31] : memref<16x128xf32, #tpu.memory_space<vmem>>, vector<16x128xf32>
    tpu.vector_store %arg10[%c0_30, %c0_31], %54 {strides = array<i32>} : memref<16x128xf32, #tpu.memory_space<vmem>>, vector<16x128xf32>,
    return
  }
  func.func @transform_0(%arg0: i32) -> (i32, i32) {
    %c0_i32 = arith.constant 0 : i32
    %c0_i32_0 = arith.constant 0 : i32
    return %arg0, %c0_i32 : i32, i32
  }
  func.func @transform_1(%arg0: i32) -> (i32, i32) {
    %c0_i32 = arith.constant 0 : i32
    %c0_i32_0 = arith.constant 0 : i32
    return %arg0, %c0_i32 : i32, i32
  }
  func.func @transform_2(%arg0: i32) -> (i32, i32) {
    %c0_i32 = arith.constant 0 : i32
    %c0_i32_0 = arith.constant 0 : i32
    return %arg0, %c0_i32 : i32, i32
  }
  func.func @transform_3(%arg0: i32) -> (i32, i32) {
    %c0_i32 = arith.constant 0 : i32
    %c0_i32_0 = arith.constant 0 : i32
    return %arg0, %c0_i32 : i32, i32
  }
  func.func @transform_4(%arg0: i32) -> (i32, i32) {
    %c0_i32 = arith.constant 0 : i32
    %c0_i32_0 = arith.constant 0 : i32
    %c0_i32_1 = arith.constant 0 : i32
    return %c0_i32, %c0_i32_0 : i32, i32
  }
  func.func @transform_5(%arg0: i32) -> (i32, i32) {
    %c0_i32 = arith.constant 0 : i32
    %c0_i32_0 = arith.constant 0 : i32
    %c0_i32_1 = arith.constant 0 : i32
    return %c0_i32, %c0_i32_0 : i32, i32
  }
  func.func @transform_6(%arg0: i32) -> (i32, i32) {
    %c0_i32 = arith.constant 0 : i32
    %c0_i32_0 = arith.constant 0 : i32
    %c0_i32_1 = arith.constant 0 : i32
    return %c0_i32, %c0_i32_0 : i32, i32
  }
  func.func @transform_7(%arg0: i32) -> (i32, i32) {
    %c0_i32 = arith.constant 0 : i32
    %c0_i32_0 = arith.constant 0 : i32
    %c0_i32_1 = arith.constant 0 : i32
    return %c0_i32, %c0_i32_0 : i32, i32
  }
  func.func @transform_8(%arg0: i32) -> (i32, i32) {
    %c0_i32 = arith.constant 0 : i32
    %c0_i32_0 = arith.constant 0 : i32
    return %arg0, %c0_i32 : i32, i32
  }
  func.func @transform_9(%arg0: i32) -> (i32, i32) {
    %c0_i32 = arith.constant 0 : i32
    %c0_i32_0 = arith.constant 0 : i32
    return %arg0, %c0_i32 : i32, i32
  }
}

</mosaic_0001>

<bundles_post_ra>
// kernel: tpu_custom_call.1
= control target key start
LH: loop header
LB: loop body
LE: loop exit
PB: predicated region body
PF: predicated region fallthrough
CT: control target
= control target key end

     0   :  { %15 = vsyncpa [#allocation3], 0  ;;  %s1183_s0 = inlined_call_operand.hbm [shape: f32[16,128], index: 0, kind: input, shape index: {}]   ;;  %s1184_s1 = inlined_call_operand.hbm [shape: f32[16,128], index: 1, kind: input, shape index: {}]   ;;  %s1185_s2 = inlined_call_operand.hbm [shape: f32[16,128], index: 2, kind: input, shape index: {}]   ;;  %s1186_s3 = inlined_call_operand.hbm [shape: f32[16,128], index: 3, kind: input, shape index: {}]   ;;  %s1187_s4 = inlined_call_operand.hbm [shape: f32[128,384], index: 4, kind: input, shape index: {}]   ;;  %s1188_s5 = inlined_call_operand.vmem [shape: f32[1,384], index: 5, kind: input, shape index: {}]   ;;  %s1189_s6 = inlined_call_operand.hbm [shape: f32[128,128], index: 6, kind: input, shape index: {}]   ;;  %s1190_s7 = inlined_call_operand.vmem [shape: f32[1,128], index: 7, kind: input, shape index: {}]   ;;  %s1191_s8 = inlined_call_operand.hbm [shape: f32[16,128], index: 8, kind: output, shape index: {0}]   ;;  %s1192_s9 = inlined_call_operand.hbm [shape: f32[16,128], index: 9, kind: output, shape index: {1}]  }
   0x1   :  { %16 = vsyncpa [#allocation6], 0 }
   0x2   :  { %17 = vsyncpa [#allocation9], 0 }
   0x3   :  { %18 = vsyncpa [#allocation12], 0 }
   0x4   :  { %19 = vsyncpa [#allocation4], 0 }
   0x5   :  { %20 = vsyncpa [#allocation15], 0  ;;  %s971_s30 = smov [#allocation5]   ;;  %s972_s11 = smov [#allocation8]  }
   0x6   :  { %s38_s10 = sshll.u32 %s971_s30, 4  ;;  %s62_s12 = sshll.u32 %s972_s11, 4  ;;  %s39_s10 = int_to_ptr.vmem [resolvable:$true] %s38_s10  ;;  %s1034_s12 = int_to_ptr.vmem [resolvable:$true] %s62_s12 }
   0x7   :  { %s783_s15 = scalar_lea.hbm %s1184_s1, 256 }
   0x8   :  { %p784_p0 = scmp.ne.s32.totalorder %s1184_s1, %s783_s15  ;;  %p787_p1 = scmp.lt.u32.totalorder %s783_s15, %s1184_s1 }
   0xa   :  { %p789_p2 = pnand %p787_p1, %p784_p0 }
   0xc   :  { %792 = shalt.err (!%p789_p2)
}
   0xd   :  { %s793_s20 = scalar_lea.vmem %s39_s10, 256  ;;  %p798_p4 = scmp.lt.s32.totalorder %s39_s10, %s39_s10 }
   0xe   :  { %p794_p3 = scmp.ne.s32.totalorder %s39_s10, %s793_s20  ;;  %p799_p5 = scmp.lt.s32.totalorder %s793_s20, %s793_s20 }
  0x10   :  { %p800_p6 = por %p799_p5, %p798_p4 }
  0x12   :  { %p801_p7 = pnand %p800_p6, %p794_p3 }
  0x14   :  { %804 = shalt.err (!%p801_p7)
}
  0x15   :  { %s973_s21 = smov 128   ;;  %s974_s22 = smov 8  }
  0x16   :  { %44 = dma.hbm_to_vmem [thread:$0]  %s1184_s1, 256, %s39_s10, [#allocation6], %s973_s21, %s973_s21, %s974_s22  }
  0x17   :  { %s805_s27 = scalar_lea.hbm %s1186_s3, 256 }
  0x18   :  { %p806_p8 = scmp.ne.s32.totalorder %s1186_s3, %s805_s27  ;;  %p809_p9 = scmp.lt.u32.totalorder %s805_s27, %s1186_s3 }
  0x1a   :  { %p811_p10 = pnand %p809_p9, %p806_p8 }
  0x1c   :  { %814 = shalt.err (!%p811_p10)
}
  0x1d   :  { %s815_s13 = scalar_lea.vmem %s1034_s12, 256  ;;  %p820_p12 = scmp.lt.s32.totalorder %s1034_s12, %s1034_s12 }
  0x1e   :  { %p816_p11 = scmp.ne.s32.totalorder %s1034_s12, %s815_s13  ;;  %p821_p13 = scmp.lt.s32.totalorder %s815_s13, %s815_s13 }
  0x20   :  { %p822_p0 = por %p821_p13, %p820_p12 }
  0x22   :  { %p823_p1 = pnand %p822_p0, %p816_p11 }
  0x24   :  { %826 = shalt.err (!%p823_p1)
}
  0x25   :  { %68 = dma.hbm_to_vmem [thread:$0]  %s1186_s3, 256, %s1034_s12, [#allocation9], %s973_s21, %s973_s21, %s974_s22  }
  0x26   :  { %s975_s14 = smov [#allocation2]   ;;  %s976_s16 = smov [#allocation7]  }
  0x27   :  { %s26_s15 = sshll.u32 %s975_s14, 4  ;;  %s50_s17 = sshll.u32 %s976_s16, 4  ;;  %s27_s15 = int_to_ptr.vmem [resolvable:$true] %s26_s15  ;;  %s1071_s17 = int_to_ptr.vmem [resolvable:$true] %s50_s17 }
  0x28   :  { %s827_s20 = scalar_lea.hbm %s1183_s0, 256 }
  0x29   :  { %p828_p2 = scmp.ne.s32.totalorder %s1183_s0, %s827_s20  ;;  %p831_p3 = scmp.lt.u32.totalorder %s827_s20, %s1183_s0 }
  0x2b   :  { %p833_p4 = pnand %p831_p3, %p828_p2 }
  0x2d   :  { %836 = shalt.err (!%p833_p4)
}
  0x2e   :  { %s837_s3 = scalar_lea.vmem %s27_s15, 256  ;;  %p842_p6 = scmp.lt.s32.totalorder %s27_s15, %s27_s15 }
  0x2f   :  { %p838_p5 = scmp.ne.s32.totalorder %s27_s15, %s837_s3  ;;  %p843_p7 = scmp.lt.s32.totalorder %s837_s3, %s837_s3 }
  0x31   :  { %p844_p8 = por %p843_p7, %p842_p6 }
  0x33   :  { %p845_p9 = pnand %p844_p8, %p838_p5 }
  0x35   :  { %848 = shalt.err (!%p845_p9)
}
  0x36   :  { %32 = dma.hbm_to_vmem [thread:$0]  %s1183_s0, 256, %s27_s15, [#allocation3], %s973_s21, %s973_s21, %s974_s22  }
  0x37   :  { %s849_s30 = scalar_lea.hbm %s1185_s2, 256 }
  0x38   :  { %p850_p10 = scmp.ne.s32.totalorder %s1185_s2, %s849_s30  ;;  %p853_p11 = scmp.lt.u32.totalorder %s849_s30, %s1185_s2 }
  0x3a   :  { %p855_p12 = pnand %p853_p11, %p850_p10 }
  0x3c   :  { %858 = shalt.err (!%p855_p12)
}
  0x3d   :  { %s859_s14 = scalar_lea.vmem %s1071_s17, 256  ;;  %p864_p0 = scmp.lt.s32.totalorder %s1071_s17, %s1071_s17 }
  0x3e   :  { %p860_p13 = scmp.ne.s32.totalorder %s1071_s17, %s859_s14  ;;  %p865_p1 = scmp.lt.s32.totalorder %s859_s14, %s859_s14 }
  0x40   :  { %p866_p2 = por %p865_p1, %p864_p0 }
  0x42   :  { %p867_p3 = pnand %p866_p2, %p860_p13 }
  0x44   :  { %870 = shalt.err (!%p867_p3)
}
  0x45   :  { %56 = dma.hbm_to_vmem [thread:$0]  %s1185_s2, 256, %s1071_s17, [#allocation6], %s973_s21, %s973_s21, %s974_s22  }
  0x46   :  { %s977_s16 = smov [#allocation10]   ;;  %s871_s23 = scalar_lea.hbm %s1187_s4, 6144 }
  0x47   :  { %s74_s18 = sshll.u32 %s977_s16, 4  ;;  %p872_p4 = scmp.ne.s32.totalorder %s1187_s4, %s871_s23  ;;  %s75_s18 = int_to_ptr.vmem [resolvable:$true] %s74_s18 }
  0x48   :  { %p875_p5 = scmp.lt.u32.totalorder %s871_s23, %s1187_s4 }
  0x4a   :  { %p877_p6 = pnand %p875_p5, %p872_p4 }
  0x4c   :  { %880 = shalt.err (!%p877_p6)
}
  0x4d   :  { %s881_s12 = scalar_lea.vmem %s75_s18, 6144  ;;  %p886_p8 = scmp.lt.s32.totalorder %s75_s18, %s75_s18 }
  0x4e   :  { %p882_p7 = scmp.ne.s32.totalorder %s75_s18, %s881_s12  ;;  %p887_p9 = scmp.lt.s32.totalorder %s881_s12, %s881_s12 }
  0x50   :  { %p888_p10 = por %p887_p9, %p886_p8 }
  0x52   :  { %p889_p11 = pnand %p888_p10, %p882_p7 }
  0x54   :  { %892 = shalt.err (!%p889_p11)
}
  0x55   :  { %s978_s2 = smov 384   ;;  %s979_s17 = smov 24  }
  0x56   :  { %80 = dma.hbm_to_vmem [thread:$0]  %s1187_s4, 6144, %s75_s18, [#allocation9], %s978_s2, %s978_s2, %s979_s17  }
  0x57   :  { %s980_s29 = smov [#allocation11]   ;;  %s893_s1 = scalar_lea.hbm %s1189_s6, 2048 }
  0x58   :  { %s88_s30 = sshll.u32 %s980_s29, 4  ;;  %p894_p12 = scmp.ne.s32.totalorder %s1189_s6, %s893_s1  ;;  %s89_s30 = int_to_ptr.vmem [resolvable:$true] %s88_s30 }
  0x59   :  { %p897_p13 = scmp.lt.u32.totalorder %s893_s1, %s1189_s6 }
  0x5b   :  { %p899_p0 = pnand %p897_p13, %p894_p12 }
  0x5d   :  { %902 = shalt.err (!%p899_p0)
}
  0x5e   :  { %s903_s16 = scalar_lea.vmem %s89_s30, 2048  ;;  %p908_p2 = scmp.lt.s32.totalorder %s89_s30, %s89_s30 }
  0x5f   :  { %p904_p1 = scmp.ne.s32.totalorder %s89_s30, %s903_s16  ;;  %p909_p3 = scmp.lt.s32.totalorder %s903_s16, %s903_s16 }
  0x61   :  { %p910_p4 = por %p909_p3, %p908_p2 }
  0x63   :  { %p911_p5 = pnand %p910_p4, %p904_p1 }
  0x65   :  { %914 = shalt.err (!%p911_p5)
}
  0x66   :  { %94 = dma.hbm_to_vmem [thread:$0]  %s1189_s6, 2048, %s89_s30, [#allocation12], %s973_s21, %s973_s21, %s974_s22  }
  0x67   :  { %959 = dma.done.wait [#allocation3], 256  }
  0x68   :  { %960 = vsyncadd [#allocation3], 4294967040 }
  0x69   :  { %961 = dma.done.wait [#allocation6], 512  }
  0x6a   :  { %962 = vsyncadd [#allocation6], 4294966784 }
  0x6b   :  { %963 = dma.done.wait [#allocation9], 6400  }
  0x6c   :  { %964 = vsyncadd [#allocation9], 4294960896 }
  0x6d   :  { %965 = dma.done.wait [#allocation12], 2048  }
  0x6e   :  { %966 = vsyncadd [#allocation12], 4294965248  ;;  %v981_v0 = vmov 0.0   ;;  %v122_v1 = vld [vmem:[#allocation10 + $0x8] sm:$0xff]  ;;  %v125_v2 = vld [vmem:[#allocation10 + $0x20] sm:$0xff] }
  0x6f   :  { %250 = vmatprep.mubr.f32.mxu1 %v981_v0  ;;  %v338_v3 = vld [vmem:[#allocation11] sm:$0xff]  ;;  %v650_v4 = vpack.c.bf16 %v125_v2, %v122_v1  ;;  %v339_v5 = vld [vmem:[#allocation11 + $0x8] sm:$0xff]  ;;  %v124_v7 = vld [vmem:[#allocation10 + $0x18] sm:$0xff] }
  0x70   :  { %v121_v6 = vld [vmem:[#allocation10] sm:$0xff]  ;;  %v714_v8 = vpack.c.bf16 %v339_v5, %v338_v3  ;;  %v128_v10 = vld [vmem:[#allocation10 + $0x38] sm:$0xff]  ;;  %v131_v11 = vld [vmem:[#allocation10 + $0x50] sm:$0xff] }
  0x71   :  { %v652_v9 = vpack.c.bf16 %v124_v7, %v121_v6  ;;  %v340_v12 = vld [vmem:[#allocation11 + $0x10] sm:$0xff]  ;;  %651 = vmatprep.subr.bf16.mxu1 %v650_v4  ;;  %v654_v13 = vpack.c.bf16 %v131_v11, %v128_v10  ;;  %v341_v14 = vld [vmem:[#allocation11 + $0x18] sm:$0xff]  ;;  %v130_v16 = vld [vmem:[#allocation10 + $0x48] sm:$0xff] }
  0x72   :  { %v127_v15 = vld [vmem:[#allocation10 + $0x30] sm:$0xff]  ;;  %715 = vmatprep.subr.bf16.mxu0 %v714_v8  ;;  %v718_v17 = vpack.c.bf16 %v341_v14, %v340_v12  ;;  %v134_v19 = vld [vmem:[#allocation10 + $0x68] sm:$0xff]  ;;  %v137_v20 = vld [vmem:[#allocation10 + $0x80] sm:$0xff] }
  0x73   :  { %653 = vmatpush1.bf16.msra.mxu1 %v652_v9  ;;  %v656_v18 = vpack.c.bf16 %v130_v16, %v127_v15  ;;  %v342_v21 = vld [vmem:[#allocation11 + $0x20] sm:$0xff]  ;;  %717 = vmatpush3.bf16.msra.mxu0 %v714_v8  ;;  %v658_v22 = vpack.c.bf16 %v137_v20, %v134_v19  ;;  %v343_v23 = vld [vmem:[#allocation11 + $0x28] sm:$0xff]  ;;  %v136_v25 = vld [vmem:[#allocation10 + $0x78] sm:$0xff] }
  0x74   :  { %655 = vmatprep.subr.bf16.mxu1 %v654_v13  ;;  %v133_v24 = vld [vmem:[#allocation10 + $0x60] sm:$0xff]  ;;  %719 = vmatprep.subr.bf16.mxu0 %v718_v17  ;;  %v722_v26 = vpack.c.bf16 %v343_v23, %v342_v21  ;;  %v140_v27 = vld [vmem:[#allocation10 + $0x98] sm:$0xff]  ;;  %v143_v28 = vld [vmem:[#allocation10 + $0xb0] sm:$0xff] }
  0x75   :  { %v344_v29 = vld [vmem:[#allocation11 + $0x30] sm:$0xff]  ;;  %v345_v30 = vld [vmem:[#allocation11 + $0x38] sm:$0xff]  ;;  %v660_v31 = vpack.c.bf16 %v136_v25, %v133_v24  ;;  %v662_v32 = vpack.c.bf16 %v143_v28, %v140_v27  ;;  %v142_v34 = vld [vmem:[#allocation10 + $0xa8] sm:$0xff] }
  0x76   :  { %v139_v33 = vld [vmem:[#allocation10 + $0x90] sm:$0xff]  ;;  %v726_v35 = vpack.c.bf16 %v345_v30, %v344_v29  ;;  %v146_v36 = vld [vmem:[#allocation10 + $0xc8] sm:$0xff]  ;;  %v149_v37 = vld [vmem:[#allocation10 + $0xe0] sm:$0xff] }
  0x77   :  { %657 = vmatpush1.bf16.msra.mxu1 %v656_v18  ;;  %721 = vmatpush3.bf16.msra.mxu0 %v718_v17  ;;  %v346_v38 = vld [vmem:[#allocation11 + $0x40] sm:$0xff]  ;;  %v347_v39 = vld [vmem:[#allocation11 + $0x48] sm:$0xff]  ;;  %v664_v40 = vpack.c.bf16 %v142_v34, %v139_v33  ;;  %v666_v41 = vpack.c.bf16 %v149_v37, %v146_v36  ;;  %v148_v43 = vld [vmem:[#allocation10 + $0xd8] sm:$0xff] }
  0x78   :  { %659 = vmatprep.subr.bf16.mxu1 %v658_v22  ;;  %723 = vmatprep.subr.bf16.mxu0 %v722_v26  ;;  %v145_v42 = vld [vmem:[#allocation10 + $0xc0] sm:$0xff]  ;;  %v730_v44 = vpack.c.bf16 %v347_v39, %v346_v38  ;;  %v152_v45 = vld [vmem:[#allocation10 + $0xf8] sm:$0xff]  ;;  %v155_v46 = vld [vmem:[#allocation10 + $0x110] sm:$0xff]  ;;  %v171_v39 = vlaneseq }
  0x79   :  { %v348_v47 = vld [vmem:[#allocation11 + $0x50] sm:$0xff]  ;;  %v349_v48 = vld [vmem:[#allocation11 + $0x58] sm:$0xff]  ;;  %v668_v49 = vpack.c.bf16 %v148_v43, %v145_v42  ;;  %v115_v50 = vld [vmem:[#allocation2] sm:$0xff]  ;;  %v670_v51 = vpack.c.bf16 %v155_v46, %v152_v45 }
  0x7a   :  { %v151_v52 = vld [vmem:[#allocation10 + $0xf0] sm:$0xff]  ;;  %v154_v53 = vld [vmem:[#allocation10 + $0x108] sm:$0xff]  ;;  %v734_v54 = vpack.c.bf16 %v349_v48, %v348_v47  ;;  %v161_v56 = vld [vmem:[#allocation10 + $0x140] sm:$0xff]  ;;  %644 = vmatprep.mubr.f32.mxu0 %v115_v50 }
  0x7b   :  { %661 = vmatpush1.bf16.msra.mxu1 %v660_v31  ;;  %725 = vmatpush3.bf16.msra.mxu0 %v722_v26  ;;  %v158_v55 = vld [vmem:[#allocation10 + $0x128] sm:$0xff]  ;;  %v350_v57 = vld [vmem:[#allocation11 + $0x60] sm:$0xff]  ;;  %v672_v59 = vpack.c.bf16 %v154_v53, %v151_v52  ;;  %v160_v62 = vld [vmem:[#allocation10 + $0x138] sm:$0xff] }
  0x7c   :  { %663 = vmatprep.subr.bf16.mxu1 %v662_v32  ;;  %727 = vmatprep.subr.bf16.mxu0 %v726_v35  ;;  %v351_v58 = vld [vmem:[#allocation11 + $0x68] sm:$0xff]  ;;  %v674_v60 = vpack.c.bf16 %v161_v56, %v158_v55  ;;  %v157_v61 = vld [vmem:[#allocation10 + $0x120] sm:$0xff]  ;;  %v164_v1 = vld [vmem:[#allocation10 + $0x158] sm:$0xff] }
  0x7d   :  { %v738_v63 = vpack.c.bf16 %v351_v58, %v350_v57  ;;  %v167_v2 = vld [vmem:[#allocation10 + $0x170] sm:$0xff]  ;;  %v353_v4 = vld [vmem:[#allocation11 + $0x78] sm:$0xff]  ;;  %v676_v5 = vpack.c.bf16 %v160_v62, %v157_v61  ;;  %v166_v8 = vld [vmem:[#allocation10 + $0x168] sm:$0xff] }
  0x7e   :  { %v352_v3 = vld [vmem:[#allocation11 + $0x70] sm:$0xff]  ;;  %v678_v6 = vpack.c.bf16 %v167_v2, %v164_v1  ;;  %v126_v11 = vld [vmem:[#allocation10 + $0x28] sm:$0xff]  ;;  %v129_v15 = vld [vmem:[#allocation10 + $0x40] sm:$0xff] }
  0x7f   :  { %665 = vmatpush1.bf16.msra.mxu1 %v664_v40  ;;  %729 = vmatpush3.bf16.msra.mxu0 %v726_v35  ;;  %v163_v7 = vld [vmem:[#allocation10 + $0x150] sm:$0xff]  ;;  %v742_v9 = vpack.c.bf16 %v353_v4, %v352_v3  ;;  %v132_v16 = vld [vmem:[#allocation10 + $0x58] sm:$0xff]  ;;  %v116_v18 = vld [vmem:[#allocation2 + $0x8] sm:$0xff]  ;;  %v1137_v40 = vshrl.u32 %v171_v39, 7 }
  0x80   :  { %667 = vmatprep.subr.bf16.mxu1 %v666_v41  ;;  %731 = vmatprep.subr.bf16.mxu0 %v730_v44  ;;  %v123_v10 = vld [vmem:[#allocation10 + $0x10] sm:$0xff]  ;;  %v680_v12 = vpack.c.bf16 %v166_v8, %v163_v7  ;;  %v686_v19 = vpack.c.bf16 %v132_v16, %v129_v15  ;;  %v118_v20 = vld [vmem:[#allocation5 + $0x8] sm:$0xff]  ;;  %v138_v22 = vld [vmem:[#allocation10 + $0x88] sm:$0xff] }
  0x81   :  { %v117_v13 = vld [vmem:[#allocation5] sm:$0xff]  ;;  %v682_v14 = vpack.c.bf16 %v126_v11, %v123_v10  ;;  %v120_v23 = vadd.f32 %v118_v20, %v116_v18  ;;  %v141_v25 = vld [vmem:[#allocation10 + $0xa0] sm:$0xff]  ;;  %v144_v26 = vld [vmem:[#allocation10 + $0xb8] sm:$0xff]  ;;  %v173_v41 = vsub.s32 0, %v1137_v40  ;;  %v177_v43 = vsub.s32 1, %v1137_v40 }
  0x82   :  { %v119_v17 = vadd.f32 %v117_v13, %v115_v50  ;;  %v135_v21 = vld [vmem:[#allocation10 + $0x70] sm:$0xff]  ;;  %v694_v27 = vpack.c.bf16 %v144_v26, %v141_v25  ;;  %v150_v29 = vld [vmem:[#allocation10 + $0xe8] sm:$0xff]  ;;  %v153_v31 = vld [vmem:[#allocation10 + $0x100] sm:$0xff] }
  0x83   :  { %669 = vmatpush1.bf16.msra.mxu1 %v668_v49  ;;  %733 = vmatpush3.bf16.msra.mxu0 %v730_v44  ;;  %v690_v24 = vpack.c.bf16 %v138_v22, %v135_v21  ;;  %v147_v28 = vld [vmem:[#allocation10 + $0xd0] sm:$0xff]  ;;  %v156_v32 = vld [vmem:[#allocation10 + $0x118] sm:$0xff]  ;;  %v165_v36 = vld [vmem:[#allocation10 + $0x160] sm:$0xff] }
  0x84   :  { %671 = vmatprep.subr.bf16.mxu1 %v670_v51  ;;  %735 = vmatprep.subr.bf16.mxu0 %v734_v54  ;;  %v698_v30 = vpack.c.bf16 %v150_v29, %v147_v28  ;;  %v702_v33 = vpack.c.bf16 %v156_v32, %v153_v31  ;;  %v159_v34 = vld [vmem:[#allocation10 + $0x130] sm:$0xff]  ;;  %v168_v37 = vld [vmem:[#allocation10 + $0x178] sm:$0xff]  ;;  %v1143_v42 = vld [vmem:[%s1188_s5] sm:$0x7]  ;;  %s982_s5 = smov [#allocation14]  }
  0x85   :  { %v710_v38 = vpack.c.bf16 %v168_v37, %v165_v36  ;;  %v174_v44 = vrot.slane %v1143_v42, %v173_v41  ;;  %v178_v45 = vrot.slane %v1143_v42, %v177_v43  ;;  %v538_v47 = vld [vmem:[%s1190_s7] ss:$0 sm:$0xff]  ;;  %v482_v31 = vld [vmem:[#allocation8] sm:$0xff]  ;;  %s519_s7 = sshll.u32 %s982_s5, 4  ;;  %s520_s7 = int_to_ptr.vmem [resolvable:$true] %s519_s7 }
  0x86   :  { %s915_s24 = scalar_lea.vmem %s520_s7, 256  ;;  %p920_p7 = scmp.lt.s32.totalorder %s520_s7, %s520_s7 }
  0x87   :  { %673 = vmatpush1.bf16.msra.mxu1 %v672_v59  ;;  %737 = vmatpush3.bf16.msra.mxu0 %v734_v54  ;;  %p916_p6 = scmp.ne.s32.totalorder %s520_s7, %s915_s24  ;;  %p921_p8 = scmp.lt.s32.totalorder %s915_s24, %s915_s24 }
  0x88   :  { %675 = vmatprep.subr.bf16.mxu1 %v674_v60  ;;  %739 = vmatprep.subr.bf16.mxu0 %v738_v63 }
  0x89   :  { %p922_p9 = por %p921_p8, %p920_p7 }
  0x8b   :  { %677 = vmatpush1.bf16.msra.mxu1 %v676_v5  ;;  %741 = vmatpush3.bf16.msra.mxu0 %v738_v63  ;;  %p923_p10 = pnand %p922_p9, %p916_p6 }
  0x8c   :  { %679 = vmatprep.subr.bf16.mxu1 %v678_v6  ;;  %743 = vmatprep.subr.bf16.mxu0 %v742_v9 }
  0x8f   :  { %681 = vmatpush1.bf16.msra.mxu1 %v680_v12  ;;  %745 = vmatpush3.bf16.msra.mxu0 %v742_v9 }
  0x90   :  { %683 = vmatprep.subr.bf16.mxu1 %v682_v14 }
  0x92   :  { %251 = vmatmul.mubr.f32.vlgmr.msra.gmra.mrb[0].mxu1 %v119_v17  ;;  %645 = vmatmul.mubr.f32.vlgmr.msra.gmra.mrb[0].mxu0 %v116_v18  ;;  %v480_v18 = vld [vmem:[#allocation7] sm:$0xff] }
  0x93   :  { %685 = vmatpush3.bf16.msra.mxu1 %v682_v14  ;;  %647 = vmatprep.mubr.f32.mxu0 %v117_v13 }
  0x94   :  { %687 = vmatprep.subr.bf16.mxu1 %v686_v19  ;;  %256 = vmatprep.mubr.f32.mxu1 %v981_v0  ;;  %v162_v0 = vld [vmem:[#allocation10 + $0x148] sm:$0xff] }
  0x95   :  { %v706_v35 = vpack.c.bf16 %v162_v0, %v159_v34 }
  0x96   :  { %257 = vmatmul.mubr.f32.gmra.mrb[2].mxu1 %v120_v23  ;;  %648 = vmatmul.mubr.f32.gmra.mrb[2].mxu0 %v118_v20 }
  0x97   :  { %689 = vmatpush3.bf16.msra.mxu1 %v686_v19  ;;  %609 = vmatprep.mubr.f32.mxu1 %v119_v17  ;;  %v481_v17 = vld [vmem:[#allocation7 + $0x8] sm:$0xff] }
  0x98   :  { %691 = vmatprep.subr.bf16.mxu1 %v690_v24 }
  0x9b   :  { %693 = vmatpush3.bf16.msra.mxu1 %v690_v24 }
  0x9c   :  { %695 = vmatprep.subr.bf16.mxu1 %v694_v27 }
  0x9f   :  { %697 = vmatpush3.bf16.msra.mxu1 %v694_v27  ;;  %v483_v27 = vld [vmem:[#allocation8 + $0x8] sm:$0xff] }
  0xa0   :  { %699 = vmatprep.subr.bf16.mxu1 %v698_v30 }
  0xa3   :  { %701 = vmatpush3.bf16.msra.mxu1 %v698_v30 }
  0xa4   :  { %703 = vmatprep.subr.bf16.mxu1 %v702_v33 }
  0xa7   :  { %705 = vmatpush3.bf16.msra.mxu1 %v702_v33 }
  0xa8   :  { %707 = vmatprep.subr.bf16.mxu1 %v706_v35 }
  0xab   :  { %709 = vmatpush3.bf16.msra.mxu1 %v706_v35  ;;  %v181_v35 = vsub.s32 2, %v1137_v40 }
  0xac   :  { %711 = vmatprep.subr.bf16.mxu1 %v710_v38 }
  0xad   :  { %v182_v41 = vrot.slane %v1143_v42, %v181_v35 }
  0xaf   :  { %713 = vmatpush3.bf16.msra.mxu1 %v710_v38 }
  0xb2   :  { %610 = vmatmul.mubr.f32.vlgmr.msra.gmra.mrb[4].mxu1 %v120_v23 }
 0x165   :  { %v252_v46 = vpop.f32.mrb[0].mxu1  ;;  %v646_v49 = vpop.f32.mrb[0].mxu0 }
 0x166   :  { %v253_v48 = vadd.f32 %v252_v46, %v174_v44  ;;  %v254_v50 = vpop.f32.mrb[1].mxu1  ;;  %v433_v51 = vadd.f32 %v646_v49, %v538_v47  ;;  %v427_v53 = vpop.f32.mrb[1].mxu0 }
 0x167   :  { %v255_v52 = vadd.f32 %v254_v50, %v178_v45  ;;  %v428_v55 = vadd.f32 %v538_v47, %v427_v53 }
 0x168   :  { %v446_v54 = vmul.f32 0.5, %v253_v48  ;;  %v465_v56 = vmul.f32 0.5, %v433_v51 }
 0x169   :  { %759 = vtanh.f32 %v255_v52  ;;  %v258_v57 = vpop.f32.mrb[2].mxu1  ;;  %v464_v58 = vmul.f32 0.5, %v428_v55  ;;  %v649_v59 = vpop.f32.mrb[2].mxu0 }
 0x16a   :  { %761 = vtanh.f32 %v446_v54  ;;  %v259_v60 = vadd.f32 %v258_v57, %v174_v44  ;;  %v260_v61 = vpop.f32.mrb[3].mxu1  ;;  %v443_v62 = vadd.f32 %v649_v59, %v538_v47  ;;  %v437_v63 = vpop.f32.mrb[3].mxu0 }
 0x16b   :  { %763 = vtanh.f32 %v465_v56  ;;  %v261_v1 = vadd.f32 %v260_v61, %v178_v45  ;;  %v438_v2 = vadd.f32 %v538_v47, %v437_v63 }
 0x16c   :  { %765 = vtanh.f32 %v464_v58  ;;  %v447_v3 = vmul.f32 0.5, %v259_v60  ;;  %v473_v4 = vmul.f32 0.5, %v443_v62 }
 0x16d   :  { %767 = vtanh.f32 %v261_v1  ;;  %v472_v5 = vmul.f32 0.5, %v438_v2 }
 0x16e   :  { %769 = vtanh.f32 %v447_v3 }
 0x16f   :  { %771 = vtanh.f32 %v473_v4 }
 0x170   :  { %773 = vtanh.f32 %v472_v5 }
 0x173   :  { %v760_v6 = vpop.eup %759 }
 0x174   :  { %v762_v7 = vpop.eup %761 }
 0x175   :  { %v764_v8 = vpop.eup %763  ;;  %v450_v9 = vmul.f32 0.5, %v762_v7 }
 0x176   :  { %v766_v10 = vpop.eup %765  ;;  %v469_v11 = vmul.f32 0.5, %v764_v8 }
 0x177   :  { %v768_v12 = vpop.eup %767  ;;  %v452_v13 = vadd.f32 0.5, %v450_v9  ;;  %v468_v14 = vmul.f32 0.5, %v766_v10 }
 0x178   :  { %v770_v15 = vpop.eup %769  ;;  %v471_v16 = vadd.f32 0.5, %v469_v11 }
 0x179   :  { %v772_v19 = vpop.eup %771  ;;  %v470_v20 = vadd.f32 0.5, %v468_v14  ;;  %v484_v21 = vmul.f32 %v760_v6, %v452_v13  ;;  %v451_v22 = vmul.f32 0.5, %v770_v15 }
 0x17a   :  { %v774_v23 = vpop.eup %773  ;;  %v477_v24 = vmul.f32 0.5, %v772_v19  ;;  %v487_v25 = vmul.f32 %v481_v17, %v471_v16 }
 0x17b   :  { %v486_v26 = vmul.f32 %v480_v18, %v470_v20  ;;  %v476_v28 = vmul.f32 0.5, %v774_v23  ;;  %v453_v29 = vadd.f32 0.5, %v451_v22 }
 0x17c   :  { %v479_v30 = vadd.f32 0.5, %v477_v24 }
 0x17d   :  { %v488_v32 = vadd.f32 %v486_v26, %v484_v21  ;;  %v478_v33 = vadd.f32 0.5, %v476_v28  ;;  %v485_v34 = vmul.f32 %v768_v12, %v453_v29 }
 0x17e   :  { %v491_v0 = vmul.f32 %v483_v27, %v479_v30 }
 0x17f   :  { %v490_v36 = vmul.f32 %v482_v31, %v478_v33  ;;  %v489_v37 = vadd.f32 %v487_v25, %v485_v34 }
 0x181   :  { %v492_v38 = vadd.f32 %v490_v36, %v488_v32  ;;  %v493_v39 = vadd.f32 %v491_v0, %v489_v37 }
 0x183   :  { %500 = vst [vmem:[#allocation14] sm:$0xff] %v492_v38  ;;  %501 = vst [vmem:[#allocation14 + $0x8] sm:$0xff] %v493_v39 }
 0x184   :  { %926 = shalt.err (!%p923_p10)
}
 0x185   :  { %s927_s3 = scalar_lea.hbm %s1192_s9, 256 }
 0x186   :  { %p928_p11 = scmp.ne.s32.totalorder %s1192_s9, %s927_s3  ;;  %p931_p12 = scmp.lt.u32.totalorder %s927_s3, %s1192_s9 }
 0x188   :  { %p933_p13 = pnand %p931_p12, %p928_p11 }
 0x18a   :  { %936 = shalt.err (!%p933_p13)
}
 0x18b   :  { %525 = dma.vmem_to_hbm [thread:$0]  %s520_s7, 256, %s1192_s9, [#allocation15], %s973_s21, %s973_s21, %s974_s22   ;;  %v611_v40 = vpop.f32.mrb[4].mxu1 }
 0x18c   :  { %v335_v42 = vadd.f32 %v611_v40, %v182_v41  ;;  %v329_v43 = vpop.f32.mrb[5].mxu1  ;;  %s983_s30 = smov [#allocation13]  }
 0x18d   :  { %v330_v44 = vadd.f32 %v329_v43, %v182_v41  ;;  %s507_s11 = sshll.u32 %s983_s30, 4  ;;  %s508_s11 = int_to_ptr.vmem [resolvable:$true] %s507_s11 }
 0x18e   :  { %v457_v45 = vmul.f32 0.5, %v335_v42  ;;  %s937_s9 = scalar_lea.vmem %s508_s11, 256  ;;  %p942_p1 = scmp.lt.s32.totalorder %s508_s11, %s508_s11 }
 0x18f   :  { %v456_v46 = vmul.f32 0.5, %v330_v44  ;;  %p938_p0 = scmp.ne.s32.totalorder %s508_s11, %s937_s9  ;;  %p943_p2 = scmp.lt.s32.totalorder %s937_s9, %s937_s9 }
 0x190   :  { %775 = vtanh.f32 %v457_v45 }
 0x191   :  { %777 = vtanh.f32 %v456_v46  ;;  %p944_p3 = por %p943_p2, %p942_p1 }
 0x192   :  { %779 = vtanh.f32 %v493_v39 }
 0x193   :  { %781 = vtanh.f32 %v492_v38  ;;  %p945_p4 = pnand %p944_p3, %p938_p0 }
 0x19a   :  { %v776_v47 = vpop.eup %775 }
 0x19b   :  { %v778_v48 = vpop.eup %777  ;;  %v461_v49 = vmul.f32 0.5, %v776_v47 }
 0x19c   :  { %v460_v50 = vmul.f32 0.5, %v778_v48  ;;  %v780_v52 = vpop.eup %779 }
 0x19d   :  { %v463_v51 = vadd.f32 0.5, %v461_v49  ;;  %v782_v54 = vpop.eup %781 }
 0x19e   :  { %v462_v53 = vadd.f32 0.5, %v460_v50 }
 0x19f   :  { %v497_v55 = vmul.f32 %v780_v52, %v463_v51 }
 0x1a0   :  { %v496_v56 = vmul.f32 %v782_v54, %v462_v53 }
 0x1a1   :  { %499 = vst [vmem:[#allocation13 + $0x8] sm:$0xff] %v497_v55 }
 0x1a2   :  { %498 = vst [vmem:[#allocation13] sm:$0xff] %v496_v56 }
 0x1a3   :  { %948 = shalt.err (!%p945_p4)
}
 0x1a4   :  { %s949_s10 = scalar_lea.hbm %s1191_s8, 256 }
 0x1a5   :  { %p950_p5 = scmp.ne.s32.totalorder %s1191_s8, %s949_s10  ;;  %p953_p6 = scmp.lt.u32.totalorder %s949_s10, %s1191_s8 }
 0x1a7   :  { %p955_p7 = pnand %p953_p6, %p950_p5 }
 0x1a9   :  { %958 = shalt.err (!%p955_p7)
}
 0x1aa   :  { %513 = dma.vmem_to_hbm [thread:$0]  %s508_s11, 256, %s1191_s8, [#allocation4], %s973_s21, %s973_s21, %s974_s22  }
 0x1ab   :  { %967 = dma.done.wait [#allocation4], 256  }
 0x1ac   :  { %968 = vsyncadd [#allocation4], 4294967040 }
 0x1ad   :  { %969 = dma.done.wait [#allocation15], 256  }
 0x1ae   :  { %970 = vsyncadd [#allocation15], 4294967040 }
 0x1af   :  { %532 = vsyncpa [#allocation3], 1 }
 0x1b0   :  { %533 = vsyncpa [#allocation6], 1 }
 0x1b1   :  { %534 = vsyncpa [#allocation9], 1 }
 0x1b2   :  { %535 = vsyncpa [#allocation12], 1 }
 0x1b3   :  { %536 = vsyncpa [#allocation4], 1 }
 0x1b4   :  { %537 = vsyncpa [#allocation15], 1 }

</bundles_post_ra>
